<compile_context>
chip_gen: v6e
topology: v6e:2x2x1
jax: 0.10.0
libtpu: 0.0.40
codegen_flags: <defaults>
</compile_context>

<pallas_src>
import math

import numpy as np
import jax
import jax.numpy as jnp
from jax.experimental import pallas as pl
from jax.experimental.pallas import tpu as pltpu


def _pick_batch_block(n, per_batch_bytes, target_bytes=2 * 1024 * 1024, cap=8):
    """Largest divisor of n (<= cap) whose tile fits the byte budget, preferring >=2 grid steps."""
    cands = [d for d in range(1, min(n, cap) + 1)
             if n % d == 0 and d * per_batch_bytes <= target_bytes]
    if not cands:
        return 1
    multi = [d for d in cands if n // d >= 2]
    return max(multi) if multi else max(cands)


def _make_conv_kernel(nblk, ksize, w_pitch, out_rows, acc_dtype=jnp.float32):
    span = out_rows * w_pitch  # stride-1 output rows laid out with the padded pitch

    def kernel(x_ref, w_ref, b_ref, o_ref):
        # x_ref: (nblk, Cin, Lf)    zero-padded, row-flattened input (pitch = w_pitch)
        # w_ref: (K*K, Cout, Cin)   scaled weight, tap-major
        # b_ref: (Cout, 1)          bias column
        # o_ref: (nblk, Cout, out_rows * w_pitch)
        bias = b_ref[...].astype(acc_dtype)
        for b in range(nblk):
            acc = None
            for kh in range(ksize):
                for kw in range(ksize):
                    start = kh * w_pitch + kw            # static offset
                    xs = x_ref[b, :, start:start + span]  # (Cin, span)
                    wt = w_ref[kh * ksize + kw]           # (Cout, Cin)
                    contrib = jnp.dot(wt, xs.astype(acc_dtype),
                                      preferred_element_type=acc_dtype)
                    acc = contrib if acc is None else acc + contrib
            o_ref[b] = (acc + bias).astype(o_ref.dtype)

    return kernel


def equal_conv2d(x, weight, bias=None, *, stride=1, padding=0):
    """Pallas TPU forward of StyleSwin EqualConv2d.  x: (N, Cin, H, W) NCHW."""
    n, cin, h, w = x.shape
    cout, cin_w, k, k2 = weight.shape
    assert cin_w == cin and k == k2
    scale = 1.0 / math.sqrt(cin * k * k)

    hp, wp = h + 2 * padding, w + 2 * padding
    assert hp >= k and wp >= k
    out_h = (hp - k) // stride + 1
    out_w = (wp - k) // stride + 1
    oh1 = hp - k + 1                  # stride-1 row count computed in-kernel
    lf = (hp + 1) * wp                # +1 zero row so shifted windows never run OOB
    span = oh1 * wp

    # Zero-pad spatially (+ one safety row) and flatten rows; stays channel-major.
    xp = jnp.pad(x, ((0, 0), (0, 0), (padding, padding + 1), (padding, padding)))
    x_flat = xp.reshape(n, cin, lf)

    # Fold the equalized-LR scale into the tiny weight; tap-major (K*K, Cout, Cin).
    w_taps = (jnp.transpose(weight, (2, 3, 0, 1)) * scale).reshape(k * k, cout, cin)
    w_taps = w_taps.astype(jnp.float32)
    b_col = (jnp.zeros((cout,), jnp.float32) if bias is None
             else bias.astype(jnp.float32)).reshape(cout, 1)

    per_batch_bytes = (cin * lf + cout * span) * x.dtype.itemsize
    nblk = _pick_batch_block(n, per_batch_bytes)
    grid = (n // nblk,)

    kernel = _make_conv_kernel(nblk, k, wp, oh1)
    wide = pl.pallas_call(
        kernel,
        out_shape=jax.ShapeDtypeStruct((n, cout, span), x.dtype),
        grid=grid,
        in_specs=[
            pl.BlockSpec((nblk, cin, lf), lambda i: (i, 0, 0)),
            pl.BlockSpec((k * k, cout, cin), lambda i: (0, 0, 0)),
            pl.BlockSpec((cout, 1), lambda i: (0, 0)),
        ],
        out_specs=pl.BlockSpec((nblk, cout, span), lambda i: (i, 0, 0)),
        compiler_params=pltpu.CompilerParams(
            dimension_semantics=("parallel",),
        ),
    )(x_flat, w_taps, b_col)

    # Free reshape back to (N, Cout, oh1, Wp); crop padded pitch / apply stride.
    wide = wide.reshape(n, cout, oh1, wp)
    row_hi = (out_h - 1) * stride + 1
    col_hi = (out_w - 1) * stride + 1
    return wide[:, :, :row_hi:stride, :col_hi:stride]


def equal_conv2d_ref(x, weight, bias, stride, padding):
    """Pure-JAX reference matching F.conv2d(x, weight*scale, bias, stride, padding)."""
    cout, cin, k, _ = weight.shape
    scale = 1.0 / math.sqrt(cin * k * k)
    y = jax.lax.conv_general_dilated(
        x, weight * scale, window_strides=(stride, stride),
        padding=[(padding, padding), (padding, padding)],
        dimension_numbers=("NCHW", "OIHW", "NCHW"),
        precision=jax.lax.Precision.HIGHEST)
    if bias is not None:
        y = y + bias.reshape(1, -1, 1, 1)
    return y


if __name__ == "__main__":
    key = jax.random.PRNGKey(0)
    kx, kw3, kb3, kw1 = jax.random.split(key, 4)

    N, Cin, H, W = 2, 4, 16, 16
    Cout = 8
    x = jax.random.normal(kx, (N, Cin, H, W), dtype=jnp.float32)

    # 3x3, stride 1, padding 1, with bias (typical StyleSwin discriminator conv).
    w3 = jax.random.normal(kw3, (Cout, Cin, 3, 3), dtype=jnp.float32)
    b3 = jax.random.normal(kb3, (Cout,), dtype=jnp.float32)
    out3 = equal_conv2d(x, w3, b3, stride=1, padding=1)
    jax.block_until_ready(out3)
    assert out3.shape == (N, Cout, H, W), out3.shape
    ref3 = equal_conv2d_ref(x, w3, b3, 1, 1)
    np.testing.assert_allclose(np.asarray(out3), np.asarray(ref3), atol=2e-3, rtol=2e-3)

    # 1x1, stride 1, padding 0, no bias.
    w1 = jax.random.normal(kw1, (Cout, Cin, 1, 1), dtype=jnp.float32)
    out1 = equal_conv2d(x, w1, None, stride=1, padding=0)
    jax.block_until_ready(out1)
    assert out1.shape == (N, Cout, H, W), out1.shape
    ref1 = equal_conv2d_ref(x, w1, None, 1, 0)
    np.testing.assert_allclose(np.asarray(out1), np.asarray(ref1), atol=2e-3, rtol=2e-3)

    print("KERNEL_OK")
</pallas_src>

<mosaic_0001>
module attributes {stable_mosaic.version = 11 : i64} {
  func.func @kernel(%arg0: i32, %arg1: memref<1x4x342xf32, #tpu.memory_space<vmem>>, %arg2: memref<9x8x4xf32, #tpu.memory_space<vmem>>, %arg3: memref<8x1xf32, #tpu.memory_space<vmem>>, %arg4: memref<1x8x288xf32, #tpu.memory_space<vmem>>) attributes {dimension_semantics = [#tpu.dimension_semantics<parallel>], iteration_bounds = array<i64: 2>, scalar_prefetch = 0 : i64, scratch_operands = 0 : i64, tpu.core_type = #tpu.core_type<tc>, window_params = [{transform_indices = @transform_0, window_bounds = array<i64: 1, 4, 342>}, {pipeline_mode = #tpu.pipeline_mode<synchronous>, transform_indices = @transform_1, window_bounds = array<i64: 9, 8, 4>}, {pipeline_mode = #tpu.pipeline_mode<synchronous>, transform_indices = @transform_2, window_bounds = array<i64: 8, 1>}, {transform_indices = @transform_3, window_bounds = array<i64: 1, 8, 288>}]} {
    %c0 = arith.constant 0 : index
    %c0_0 = arith.constant 0 : index
    %0 = vector.load %arg3[%c0, %c0_0] : memref<8x1xf32, #tpu.memory_space<vmem>>, vector<8x1xf32>
    %c0_1 = arith.constant 0 : index
    %c0_2 = arith.constant 0 : index
    %c0_3 = arith.constant 0 : index
    %1 = vector.load %arg1[%c0_1, %c0_2, %c0_3] : memref<1x4x342xf32, #tpu.memory_space<vmem>>, vector<1x4x288xf32>
    %2 = vector.shape_cast %1 : vector<1x4x288xf32> to vector<4x288xf32>
    %c0_4 = arith.constant 0 : index
    %c0_5 = arith.constant 0 : index
    %c0_6 = arith.constant 0 : index
    %3 = vector.load %arg2[%c0_4, %c0_5, %c0_6] : memref<9x8x4xf32, #tpu.memory_space<vmem>>, vector<1x8x4xf32>
    %4 = vector.shape_cast %3 : vector<1x8x4xf32> to vector<8x4xf32>
    %cst = arith.constant dense<0.000000e+00> : vector<8x288xf32>
    %5 = tpu.matmul %4, %2, %cst {dimension_numbers = #tpu.dot_dimension_numbers<[1], [0], [0], [1], [0, 0, 1, 1], [], []>} : vector<8x4xf32>, vector<4x288xf32>, vector<8x288xf32> -> vector<8x288xf32>
    %c0_7 = arith.constant 0 : index
    %c0_8 = arith.constant 0 : index
    %c1 = arith.constant 1 : index
    %6 = vector.load %arg1[%c0_7, %c0_8, %c1] : memref<1x4x342xf32, #tpu.memory_space<vmem>>, vector<1x4x288xf32>
    %7 = vector.shape_cast %6 : vector<1x4x288xf32> to vector<4x288xf32>
    %c1_9 = arith.constant 1 : index
    %c0_10 = arith.constant 0 : index
    %c0_11 = arith.constant 0 : index
    %8 = vector.load %arg2[%c1_9, %c0_10, %c0_11] : memref<9x8x4xf32, #tpu.memory_space<vmem>>, vector<1x8x4xf32>
    %9 = vector.shape_cast %8 : vector<1x8x4xf32> to vector<8x4xf32>
    %cst_12 = arith.constant dense<0.000000e+00> : vector<8x288xf32>
    %10 = tpu.matmul %9, %7, %cst_12 {dimension_numbers = #tpu.dot_dimension_numbers<[1], [0], [0], [1], [0, 0, 1, 1], [], []>} : vector<8x4xf32>, vector<4x288xf32>, vector<8x288xf32> -> vector<8x288xf32>
    %11 = arith.addf %5, %10 : vector<8x288xf32>
    %c0_13 = arith.constant 0 : index
    %c0_14 = arith.constant 0 : index
    %c2 = arith.constant 2 : index
    %12 = vector.load %arg1[%c0_13, %c0_14, %c2] : memref<1x4x342xf32, #tpu.memory_space<vmem>>, vector<1x4x288xf32>
    %13 = vector.shape_cast %12 : vector<1x4x288xf32> to vector<4x288xf32>
    %c2_15 = arith.constant 2 : index
    %c0_16 = arith.constant 0 : index
    %c0_17 = arith.constant 0 : index
    %14 = vector.load %arg2[%c2_15, %c0_16, %c0_17] : memref<9x8x4xf32, #tpu.memory_space<vmem>>, vector<1x8x4xf32>
    %15 = vector.shape_cast %14 : vector<1x8x4xf32> to vector<8x4xf32>
    %cst_18 = arith.constant dense<0.000000e+00> : vector<8x288xf32>
    %16 = tpu.matmul %15, %13, %cst_18 {dimension_numbers = #tpu.dot_dimension_numbers<[1], [0], [0], [1], [0, 0, 1, 1], [], []>} : vector<8x4xf32>, vector<4x288xf32>, vector<8x288xf32> -> vector<8x288xf32>
    %17 = arith.addf %11, %16 : vector<8x288xf32>
    %c0_19 = arith.constant 0 : index
    %c0_20 = arith.constant 0 : index
    %c18 = arith.constant 18 : index
    %18 = vector.load %arg1[%c0_19, %c0_20, %c18] : memref<1x4x342xf32, #tpu.memory_space<vmem>>, vector<1x4x288xf32>
    %19 = vector.shape_cast %18 : vector<1x4x288xf32> to vector<4x288xf32>
    %c3 = arith.constant 3 : index
    %c0_21 = arith.constant 0 : index
    %c0_22 = arith.constant 0 : index
    %20 = vector.load %arg2[%c3, %c0_21, %c0_22] : memref<9x8x4xf32, #tpu.memory_space<vmem>>, vector<1x8x4xf32>
    %21 = vector.shape_cast %20 : vector<1x8x4xf32> to vector<8x4xf32>
    %cst_23 = arith.constant dense<0.000000e+00> : vector<8x288xf32>
    %22 = tpu.matmul %21, %19, %cst_23 {dimension_numbers = #tpu.dot_dimension_numbers<[1], [0], [0], [1], [0, 0, 1, 1], [], []>} : vector<8x4xf32>, vector<4x288xf32>, vector<8x288xf32> -> vector<8x288xf32>
    %23 = arith.addf %17, %22 : vector<8x288xf32>
    %c0_24 = arith.constant 0 : index
    %c0_25 = arith.constant 0 : index
    %c19 = arith.constant 19 : index
    %24 = vector.load %arg1[%c0_24, %c0_25, %c19] : memref<1x4x342xf32, #tpu.memory_space<vmem>>, vector<1x4x288xf32>
    %25 = vector.shape_cast %24 : vector<1x4x288xf32> to vector<4x288xf32>
    %c4 = arith.constant 4 : index
    %c0_26 = arith.constant 0 : index
    %c0_27 = arith.constant 0 : index
    %26 = vector.load %arg2[%c4, %c0_26, %c0_27] : memref<9x8x4xf32, #tpu.memory_space<vmem>>, vector<1x8x4xf32>
    %27 = vector.shape_cast %26 : vector<1x8x4xf32> to vector<8x4xf32>
    %cst_28 = arith.constant dense<0.000000e+00> : vector<8x288xf32>
    %28 = tpu.matmul %27, %25, %cst_28 {dimension_numbers = #tpu.dot_dimension_numbers<[1], [0], [0], [1], [0, 0, 1, 1], [], []>} : vector<8x4xf32>, vector<4x288xf32>, vector<8x288xf32> -> vector<8x288xf32>
    %29 = arith.addf %23, %28 : vector<8x288xf32>
    %c0_29 = arith.constant 0 : index
    %c0_30 = arith.constant 0 : index
    %c20 = arith.constant 20 : index
    %30 = vector.load %arg1[%c0_29, %c0_30, %c20] : memref<1x4x342xf32, #tpu.memory_space<vmem>>, vector<1x4x288xf32>
    %31 = vector.shape_cast %30 : vector<1x4x288xf32> to vector<4x288xf32>
    %c5 = arith.constant 5 : index
    %c0_31 = arith.constant 0 : index
    %c0_32 = arith.constant 0 : index
    %32 = vector.load %arg2[%c5, %c0_31, %c0_32] : memref<9x8x4xf32, #tpu.memory_space<vmem>>, vector<1x8x4xf32>
    %33 = vector.shape_cast %32 : vector<1x8x4xf32> to vector<8x4xf32>
    %cst_33 = arith.constant dense<0.000000e+00> : vector<8x288xf32>
    %34 = tpu.matmul %33, %31, %cst_33 {dimension_numbers = #tpu.dot_dimension_numbers<[1], [0], [0], [1], [0, 0, 1, 1], [], []>} : vector<8x4xf32>, vector<4x288xf32>, vector<8x288xf32> -> vector<8x288xf32>
    %35 = arith.addf %29, %34 : vector<8x288xf32>
    %c0_34 = arith.constant 0 : index
    %c0_35 = arith.constant 0 : index
    %c36 = arith.constant 36 : index
    %36 = vector.load %arg1[%c0_34, %c0_35, %c36] : memref<1x4x342xf32, #tpu.memory_space<vmem>>, vector<1x4x288xf32>
    %37 = vector.shape_cast %36 : vector<1x4x288xf32> to vector<4x288xf32>
    %c6 = arith.constant 6 : index
    %c0_36 = arith.constant 0 : index
    %c0_37 = arith.constant 0 : index
    %38 = vector.load %arg2[%c6, %c0_36, %c0_37] : memref<9x8x4xf32, #tpu.memory_space<vmem>>, vector<1x8x4xf32>
    %39 = vector.shape_cast %38 : vector<1x8x4xf32> to vector<8x4xf32>
    %cst_38 = arith.constant dense<0.000000e+00> : vector<8x288xf32>
    %40 = tpu.matmul %39, %37, %cst_38 {dimension_numbers = #tpu.dot_dimension_numbers<[1], [0], [0], [1], [0, 0, 1, 1], [], []>} : vector<8x4xf32>, vector<4x288xf32>, vector<8x288xf32> -> vector<8x288xf32>
    %41 = arith.addf %35, %40 : vector<8x288xf32>
    %c0_39 = arith.constant 0 : index
    %c0_40 = arith.constant 0 : index
    %c37 = arith.constant 37 : index
    %42 = vector.load %arg1[%c0_39, %c0_40, %c37] : memref<1x4x342xf32, #tpu.memory_space<vmem>>, vector<1x4x288xf32>
    %43 = vector.shape_cast %42 : vector<1x4x288xf32> to vector<4x288xf32>
    %c7 = arith.constant 7 : index
    %c0_41 = arith.constant 0 : index
    %c0_42 = arith.constant 0 : index
    %44 = vector.load %arg2[%c7, %c0_41, %c0_42] : memref<9x8x4xf32, #tpu.memory_space<vmem>>, vector<1x8x4xf32>
    %45 = vector.shape_cast %44 : vector<1x8x4xf32> to vector<8x4xf32>
    %cst_43 = arith.constant dense<0.000000e+00> : vector<8x288xf32>
    %46 = tpu.matmul %45, %43, %cst_43 {dimension_numbers = #tpu.dot_dimension_numbers<[1], [0], [0], [1], [0, 0, 1, 1], [], []>} : vector<8x4xf32>, vector<4x288xf32>, vector<8x288xf32> -> vector<8x288xf32>
    %47 = arith.addf %41, %46 : vector<8x288xf32>
    %c0_44 = arith.constant 0 : index
    %c0_45 = arith.constant 0 : index
    %c38 = arith.constant 38 : index
    %48 = vector.load %arg1[%c0_44, %c0_45, %c38] : memref<1x4x342xf32, #tpu.memory_space<vmem>>, vector<1x4x288xf32>
    %49 = vector.shape_cast %48 : vector<1x4x288xf32> to vector<4x288xf32>
    %c8 = arith.constant 8 : index
    %c0_46 = arith.constant 0 : index
    %c0_47 = arith.constant 0 : index
    %50 = vector.load %arg2[%c8, %c0_46, %c0_47] : memref<9x8x4xf32, #tpu.memory_space<vmem>>, vector<1x8x4xf32>
    %51 = vector.shape_cast %50 : vector<1x8x4xf32> to vector<8x4xf32>
    %cst_48 = arith.constant dense<0.000000e+00> : vector<8x288xf32>
    %52 = tpu.matmul %51, %49, %cst_48 {dimension_numbers = #tpu.dot_dimension_numbers<[1], [0], [0], [1], [0, 0, 1, 1], [], []>} : vector<8x4xf32>, vector<4x288xf32>, vector<8x288xf32> -> vector<8x288xf32>
    %53 = arith.addf %47, %52 : vector<8x288xf32>
    %54 = vector.broadcast %0 : vector<8x1xf32> to vector<8x288xf32>
    %55 = arith.addf %53, %54 : vector<8x288xf32>
    %c0_49 = arith.constant 0 : index
    %c0_50 = arith.constant 0 : index
    %c0_51 = arith.constant 0 : index
    %56 = vector.load %arg4[%c0_49, %c0_50, %c0_51] : memref<1x8x288xf32, #tpu.memory_space<vmem>>, vector<1x8x288xf32>
    %57 = vector.shape_cast %56 : vector<1x8x288xf32> to vector<8x288xf32>
    %58 = vector.shape_cast %55 : vector<8x288xf32> to vector<1x8x288xf32>
    tpu.vector_store %arg4[%c0_49, %c0_50, %c0_51], %58 {strides = array<i32>} : memref<1x8x288xf32, #tpu.memory_space<vmem>>, vector<1x8x288xf32>,
    return
  }
  func.func @transform_0(%arg0: i32) -> (i32, i32, i32) {
    %c0_i32 = arith.constant 0 : i32
    %c0_i32_0 = arith.constant 0 : i32
    %c0_i32_1 = arith.constant 0 : i32
    return %arg0, %c0_i32, %c0_i32_0 : i32, i32, i32
  }
  func.func @transform_1(%arg0: i32) -> (i32, i32, i32) {
    %c0_i32 = arith.constant 0 : i32
    %c0_i32_0 = arith.constant 0 : i32
    %c0_i32_1 = arith.constant 0 : i32
    %c0_i32_2 = arith.constant 0 : i32
    return %c0_i32, %c0_i32_0, %c0_i32_1 : i32, i32, i32
  }
  func.func @transform_2(%arg0: i32) -> (i32, i32) {
    %c0_i32 = arith.constant 0 : i32
    %c0_i32_0 = arith.constant 0 : i32
    %c0_i32_1 = arith.constant 0 : i32
    return %c0_i32, %c0_i32_0 : i32, i32
  }
  func.func @transform_3(%arg0: i32) -> (i32, i32, i32) {
    %c0_i32 = arith.constant 0 : i32
    %c0_i32_0 = arith.constant 0 : i32
    %c0_i32_1 = arith.constant 0 : i32
    return %arg0, %c0_i32, %c0_i32_0 : i32, i32, i32
  }
}

</mosaic_0001>

<bundles_post_ra>
// kernel: tpu_custom_call.1
= control target key start
LH: loop header
LB: loop body
LE: loop exit
PB: predicated region body
PF: predicated region fallthrough
CT: control target
= control target key end

     0   :  { %8 = vsyncpa [#allocation3], 0  ;;  %s2274_s0 = inlined_call_operand.vmem [shape: f32[2,4,342], index: 0, kind: input, shape index: {}]   ;;  %s2275_s1 = inlined_call_operand.vmem [shape: f32[9,8,4], index: 1, kind: input, shape index: {}]   ;;  %s2276_s2 = inlined_call_operand.vmem [shape: f32[8,1], index: 2, kind: input, shape index: {}]   ;;  %s2277_s3 = inlined_call_operand.hbm [shape: f32[2,8,288], index: 3, kind: output, shape index: {}]  }
   0x1   :  { %10 = vsyncpa [#allocation3 + $0x1], 0  ;;  %s2031_s12 = smov 0   ;;  %s2033_s13 = smov 0  }
   0x2   :  { %s2035_s14 = smov 0   ;;  %s2037_s15 = smov 0  }
   0x3 LB: > { %s2052_s16 = sadd.s32 4294967295, %s1997_s15   ;;  %s1758_s17 = sadd.s32 4294967294, %s1997_s15   ;;  %s1997_s15 = sphi %s2037_s15, %s2283_s15   ;;  %s1993_s14 = sphi %s2035_s14, %s2282_s14   ;;  %s1989_s13 = sphi %s2033_s13, %s2281_s13   ;;  %s1985_s12 = sphi %s2031_s12, %s2280_s12  }
   0x4   : > { %s2056_s18 = sadd.s32 1, %s1997_s15   ;;  %s91_s19 = sadd.s32 1, %s1993_s14 }
   0x5   : > { %s88_s20 = ssub.s32 %s1997_s15, %s2056_s18  ;;  %p101_p0 = scmp.ne.s32.totalorder %s1993_s14, %s1989_s13 }
   0x6   : > { %p89_p1 = scmp.eq.s32.totalorder %s88_s20, 0  ;;  %p102_p2 = scmp.eq.s32.totalorder %s2052_s16, 1 }
   0x7   : > { %p107_p3 = scmp.ne.s32.totalorder %s1989_s13, %s1985_s12  ;;  %p108_p4 = scmp.eq.s32.totalorder %s1758_s17, 1 }
   0x8   : > { %s2067_s21 = scalar_select %p89_p1, %s1993_s14, %s91_s19  }
   0x9   : > { %p2069_p5 = por %p102_p2, %p101_p0  ;;  %p2073_p6 = por %p108_p4, %p107_p3 }
   0xa   : > { %p1761_p7 = scmp.ge.s32.totalorder %s1997_s15, 1  ;;  %p140_p8 = scmp.lt.s32.totalorder %s1997_s15, 3 }
   0xc   : > { %p141_p9 = pnand %p1761_p7, %p140_p8 }
   0xd   : > { %p164_p10 = scmp.lt.s32.totalorder (!%p141_p9), %s2052_s16, 1  ;;  %s2001_s29 = smov (!%p141_p9), 127  }
   0xe   : > { %144 = sbr.rel (%p141_p9) target bundleno = 399 (0x18f), region = 32  ;;  %s2002_s30 = smov (!%p141_p9), 126  }
   0xf   : > { %s2003_s4 = smov (!%p141_p9), 110   ;;  %s2004_s5 = smov (!%p141_p9), 109  }
  0x10   : > { %s2005_s6 = smov (!%p141_p9), 108   ;;  %s2006_s7 = smov (!%p141_p9), 92  }
  0x11   : > { %s2008_s8 = smov (!%p141_p9), 91   ;;  %s2009_s9 = smov (!%p141_p9), 90  }
  0x12   : > { %s161_s17 = sand.u32 (!%p141_p9), 1, %s1989_s13   ;;  %s1884_s20 = smul.u32 (!%p141_p9), 384, %s2052_s16 }
  0x13   : > { %v1999_v0 = vmov 0.0   ;;  %vm2000_vm0 = vmmov 0   ;;  %s165_s24 = scalar_select %p164_p10, %s2052_s16, 1  ;;  %v2007_v10 = vmov 0   ;;  %v169_v12 = vld [vmem:[%s2276_s2] sm:$0xff]  ;;  %vm191_vm1 = vcmask 1043456  }
  0x14   : > { %1837 = vmatprep.subr.mxu1 %v1999_v0  ;;  %1839 = vmatprep.mubr.msk.f32.mxu1 %vm2000_vm0, %v1999_v0  ;;  %v1763_v13 = vld [vmem:[%s2275_s1 + $0x8] sm:$0xff]  ;;  %vm187_vm2 = vcmask 31744   ;;  %v172_v16 = vld [vmem:[%s2275_s1] sm:$0xff]  ;;  %vm184_vm3 = vcmask 1039360   ;;  %v1774_v19 = vld [vmem:[%s2275_s1 + $0x10] sm:$0xff]  ;;  %vm502_vm4 = vcmask 1031168  }
  0x15   : > { %262 = vmatprep.mubr.f32.mxu0 %v1999_v0  ;;  %s1883_s25 = smul.u32 12, %s165_s24  ;;  %1935 = vset.pattern.permute.xlu0 %v2007_v10  ;;  %v1780_v26 = vld [vmem:[%s2275_s1 + $0x18] sm:$0xff]  ;;  %vm671_vm5 = vcmask 900096   ;;  %vm840_vm6 = vcmask 891904   ;;  %v1786_v35 = vld [vmem:[%s2275_s1 + $0x20] sm:$0xff]  ;;  %vm1009_vm7 = vcmask 883712  }
  0x16   : > { %v1792_v40 = vld [vmem:[%s2275_s1 + $0x28] sm:$0xff]  ;;  %vm1178_vm8 = vcmask 752640   ;;  %v1798_v45 = vld [vmem:[%s2275_s1 + $0x30] sm:$0xff]  ;;  %vm1347_vm9 = vcmask 744448   ;;  %v1804_v50 = vld [vmem:[%s2275_s1 + $0x38] sm:$0xff]  ;;  %vm1516_vm10 = vcmask 736256  }
  0x17   : > { %s2088_s28 = scalar_lea.vmem %s2274_s0, %s1883_s25  ;;  %v1810_v57 = vld [vmem:[%s2275_s1 + $0x40] sm:$0xff]  ;;  %s1882_s19 = smul.u32 24, %s161_s17  ;;  %vm1682_vm11 = vcmask 261120  }
  0x18   : > { %v171_v1 = vld [vmem:[%s2088_s28 + $0x8] sm:$0xf]  ;;  %v2092_v2 = vld [vmem:[%s2088_s28] sm:$0xff]  ;;  %s2010_s16 = smov [#allocation2]  }
  0x19   : > { %182 = vrot.lane.b32.xlu0 %v171_v1, %s2001_s29  ;;  %178 = vrot.lane.b32.xlu1 %v2092_v2, %s2001_s29  ;;  %v490_v3 = vld [vmem:[%s2088_s28 + $0x8] sm:$0xf]  ;;  %v2098_v4 = vcombine.high %v2092_v2, %v2092_v2  ;;  %s163_s24 = scalar_lea.vmem [#allocation2], %s1882_s19 }
  0x1a   : > { %v659_v5 = vld [vmem:[%s2088_s28 + $0x8] sm:$0xf]  ;;  %s1699_s25 = sshll.u32 %s163_s24, 4  ;;  %s1700_s25 = int_to_ptr.vmem [resolvable:$true] %s1699_s25 }
  0x1b   : > { %v828_v6 = vld [vmem:[%s2088_s28 + $0x8] sm:$0xf] }
  0x1c   : > { %v997_v7 = vld [vmem:[%s2088_s28 + $0x8] sm:$0xf] }
  0x1d   : > { %500 = vrot.lane.b32.xlu0 %v490_v3, %s2002_s30  ;;  %496 = vrot.lane.b32.xlu1 %v2092_v2, %s2002_s30  ;;  %v1166_v8 = vld [vmem:[%s2088_s28 + $0x8] sm:$0xf] }
  0x1e   : > { %v1335_v9 = vld [vmem:[%s2088_s28 + $0x8] sm:$0xf] }
  0x1f   : > { %v1504_v11 = vld [vmem:[%s2088_s28 + $0x8] sm:$0xf]  ;;  %s1697_s28 = scalar_lea.hbm %s2277_s3, %s1884_s20 }
  0x21   : > { %498 = vrot.lane.b32.xlu1 %v2098_v4, %s2002_s30  ;;  %180 = vrot.lane.b32.xlu0 %v2098_v4, %s2001_s29  ;;  %s1685_s29 = scalar_lea.sflag [#allocation3], %s161_s17  ;;  %s1937_s30 = scalar_lea.vmem %s1700_s25, 384 }
  0x22   : > { %p1938_p11 = scmp.ne.s32.totalorder %s1700_s25, %s1937_s30 }
  0x24   : > { %p1939_p12 = pnand %p1938_p11, %p2069_p5 }
  0x25   : > { %669 = vrot.lane.b32.xlu1 %v659_v5, %s2003_s4  ;;  %667 = vrot.lane.b32.xlu0 %v2098_v4, %s2003_s4 }
  0x26   : > { %p1940_p13 = pneg %p1939_p12 }
  0x29   : > { %836 = vrot.lane.b32.xlu1 %v2098_v4, %s2004_s5  ;;  %665 = vrot.lane.b32.xlu0 %v2092_v2, %s2003_s4  ;;  %s1941_s4 = sshll.u32 %s2010_s16, 4  ;;  %s1942_s4 = int_to_ptr.vmem [resolvable:$false] %s1941_s4 }
  0x2a   : > { %p1944_p0 = scmp.lt.s32.totalorder %s1700_s25, %s1942_s4 }
  0x2d   : > { %834 = vrot.lane.b32.xlu1 %v2092_v2, %s2004_s5  ;;  %838 = vrot.lane.b32.xlu0 %v828_v6, %s2004_s5  ;;  %s1943_s5 = scalar_lea.vmem %s1942_s4, 768 }
  0x2e   : > { %p1945_p1 = scmp.lt.s32.totalorder %s1943_s5, %s1937_s30 }
  0x30   : > { %p1946_p2 = por %p1945_p1, %p1944_p0 }
  0x31   : > { %1007 = vrot.lane.b32.xlu1 %v997_v7, %s2005_s6  ;;  %1005 = vrot.lane.b32.xlu0 %v2098_v4, %s2005_s6 }
  0x32   : > { %p1947_p3 = pnand %p1946_p2, %p1940_p13 }
  0x35   : > { %1174 = vrot.lane.b32.xlu1 %v2098_v4, %s2006_s7  ;;  %1003 = vrot.lane.b32.xlu0 %v2092_v2, %s2005_s6 }
  0x39   : > { %1172 = vrot.lane.b32.xlu1 %v2092_v2, %s2006_s7  ;;  %1176 = vrot.lane.b32.xlu0 %v1166_v8, %s2006_s7 }
  0x3d   : > { %1345 = vrot.lane.b32.xlu1 %v1335_v9, %s2008_s8  ;;  %1343 = vrot.lane.b32.xlu0 %v2098_v4, %s2008_s8 }
  0x41   : > { %1512 = vrot.lane.b32.xlu1 %v2098_v4, %s2009_s9  ;;  %1341 = vrot.lane.b32.xlu0 %v2092_v2, %s2008_s8 }
  0x45   : > { %1510 = vrot.lane.b32.xlu1 %v2092_v2, %s2009_s9  ;;  %1514 = vrot.lane.b32.xlu0 %v1504_v11, %s2009_s9 }
  0x49   : > { %1674 = vperm.xlu0 %1935, %v169_v12  }
  0x8b   : > { %v183_v14 = vpop.permute.xlu0 %182  ;;  %v179_v15 = vpop.permute.xlu1 %178 }
  0x8c   : > { %1838 = vmatpush3.msk.msra.mxu1 %vm191_vm1, %v183_v14 }
  0x8d   : > { %1840 = vmatmul.mubr.msk.f32.vlgmr.msra.gmra.mxu1 %vm187_vm2, %v1763_v13  ;;  %1842 = vmatprep.subr.mxu1 %v1999_v0 }
  0x8e   : > { %1843 = vmatpush3.msk.msra.mxu1 %vm191_vm1, %v171_v1  ;;  %1844 = vmatprep.mubr.msk.f32.mxu1 %vm2000_vm0, %v1999_v0 }
  0x8f   : > { %v501_v17 = vpop.permute.xlu0 %500  ;;  %v497_v18 = vpop.permute.xlu1 %496  ;;  %1847 = vmatprep.subr.mxu1 %v1999_v0 }
  0x91   : > { %1845 = vmatmul.mubr.msk.f32.vlgmr.msra.gmra.mxu1 %vm187_vm2, %v172_v16 }
  0x92   : > { %1848 = vmatpush3.msk.msra.mxu1 %vm191_vm1, %v501_v17  ;;  %1849 = vmatprep.mubr.msk.f32.mxu1 %vm2000_vm0, %v1999_v0 }
  0x93   : > { %v499_v20 = vpop.permute.xlu1 %498  ;;  %v181_v21 = vpop.permute.xlu0 %180  ;;  %1852 = vmatprep.subr.mxu1 %v1999_v0 }
  0x94   : > { %v186_v22 = vsel %vm184_vm3, %v181_v21, %v183_v14  ;;  %v185_v23 = vsel %vm184_vm3, %v179_v15, %v181_v21  ;;  %v504_v27 = vsel %vm502_vm4, %v499_v20, %v501_v17  ;;  %v503_v28 = vsel %vm502_vm4, %v497_v18, %v499_v20 }
  0x95   : > { %1764 = vmatprep.subr.msk.mxu0 %vm191_vm1, %v186_v22  ;;  %1850 = vmatmul.mubr.msk.f32.vlgmr.msra.gmra.mxu1 %vm187_vm2, %v1774_v19 }
  0x96   : > { %1765 = vmatpush1.msk.msra.mxu0 %vm191_vm1, %v185_v23  ;;  %1854 = vmatprep.mubr.msk.f32.mxu1 %vm2000_vm0, %v1999_v0 }
  0x97   : > { %v670_v24 = vpop.permute.xlu1 %669  ;;  %1766 = vmatmul.mubr.msk.f32.vlgmr.msra.gmra.mxu0 %vm187_vm2, %v1763_v13  ;;  %1769 = vmatprep.subr.msk.mxu0 %vm191_vm1, %v2098_v4  ;;  %v668_v25 = vpop.permute.xlu0 %667 }
  0x98   : > { %1770 = vmatpush1.msk.msra.mxu0 %vm191_vm1, %v2092_v2  ;;  %1853 = vmatpush3.msk.msra.mxu1 %vm191_vm1, %v670_v24  ;;  %v673_v31 = vsel %vm671_vm5, %v668_v25, %v670_v24 }
  0x99   : > { %1775 = vmatprep.subr.msk.mxu0 %vm191_vm1, %v504_v27  ;;  %412 = vmatprep.mubr.f32.mxu0 %v1999_v0 }
  0x9a   : > { %1857 = vmatprep.subr.mxu1 %v1999_v0  ;;  %1855 = vmatmul.mubr.msk.f32.vlgmr.msra.gmra.mxu1 %vm187_vm2, %v1780_v26 }
  0x9b   : > { %v837_v29 = vpop.permute.xlu1 %836  ;;  %1771 = vmatmul.mubr.msk.f32.vlgmr.msra.gmra.mxu0 %vm187_vm2, %v172_v16  ;;  %v666_v30 = vpop.permute.xlu0 %665  ;;  %1859 = vmatprep.mubr.msk.f32.mxu1 %vm2000_vm0, %v1999_v0 }
  0x9c   : > { %1776 = vmatpush1.msk.msra.mxu0 %vm191_vm1, %v503_v28  ;;  %578 = vmatprep.mubr.f32.mxu0 %v1999_v0  ;;  %v672_v32 = vsel %vm671_vm5, %v666_v30, %v668_v25 }
  0x9d   : > { %1781 = vmatprep.subr.msk.mxu0 %vm191_vm1, %v673_v31 }
  0x9f   : > { %v835_v33 = vpop.permute.xlu1 %834  ;;  %1777 = vmatmul.mubr.msk.f32.vlgmr.msra.gmra.mxu0 %vm187_vm2, %v1774_v19  ;;  %v839_v34 = vpop.permute.xlu0 %838 }
  0xa0   : > { %1782 = vmatpush1.msk.msra.mxu0 %vm191_vm1, %v672_v32  ;;  %v842_v36 = vsel %vm840_vm6, %v837_v29, %v839_v34  ;;  %1858 = vmatpush3.msk.msra.mxu1 %vm191_vm1, %v839_v34  ;;  %v841_v37 = vsel %vm840_vm6, %v835_v33, %v837_v29 }
  0xa1   : > { %1787 = vmatprep.subr.msk.mxu0 %vm191_vm1, %v842_v36  ;;  %747 = vmatprep.mubr.f32.mxu0 %v1999_v0 }
  0xa2   : > { %1860 = vmatmul.mubr.msk.f32.vlgmr.msra.gmra.mxu1 %vm187_vm2, %v1786_v35  ;;  %1862 = vmatprep.subr.mxu1 %v1999_v0 }
  0xa3   : > { %v1008_v38 = vpop.permute.xlu1 %1007  ;;  %1783 = vmatmul.mubr.msk.f32.vlgmr.msra.gmra.mxu0 %vm187_vm2, %v1780_v26  ;;  %v1006_v39 = vpop.permute.xlu0 %1005  ;;  %1864 = vmatprep.mubr.msk.f32.mxu1 %vm2000_vm0, %v1999_v0 }
  0xa4   : > { %1788 = vmatpush1.msk.msra.mxu0 %vm191_vm1, %v841_v37  ;;  %v1011_v41 = vsel %vm1009_vm7, %v1006_v39, %v1008_v38  ;;  %1863 = vmatpush3.msk.msra.mxu1 %vm191_vm1, %v1008_v38 }
  0xa5   : > { %1793 = vmatprep.subr.msk.mxu0 %vm191_vm1, %v1011_v41  ;;  %916 = vmatprep.mubr.f32.mxu0 %v1999_v0 }
  0xa6   : > { %1865 = vmatmul.mubr.msk.f32.vlgmr.msra.gmra.mxu1 %vm187_vm2, %v1792_v40  ;;  %1867 = vmatprep.subr.mxu1 %v1999_v0 }
  0xa7   : > { %v1175_v42 = vpop.permute.xlu1 %1174  ;;  %1789 = vmatmul.mubr.msk.f32.vlgmr.msra.gmra.mxu0 %vm187_vm2, %v1786_v35  ;;  %v1004_v43 = vpop.permute.xlu0 %1003  ;;  %1869 = vmatprep.mubr.msk.f32.mxu1 %vm2000_vm0, %v1999_v0 }
  0xa8   : > { %v1010_v44 = vsel %vm1009_vm7, %v1004_v43, %v1006_v39  ;;  %1085 = vmatprep.mubr.f32.mxu0 %v1999_v0 }
  0xa9   : > { %1794 = vmatpush1.msk.msra.mxu0 %vm191_vm1, %v1010_v44 }
  0xab   : > { %v1173_v46 = vpop.permute.xlu1 %1172  ;;  %1795 = vmatmul.mubr.msk.f32.vlgmr.msra.gmra.mxu0 %vm187_vm2, %v1792_v40  ;;  %v1177_v47 = vpop.permute.xlu0 %1176 }
  0xac   : > { %v1179_v48 = vsel %vm1178_vm8, %v1173_v46, %v1175_v42  ;;  %v1180_v49 = vsel %vm1178_vm8, %v1175_v42, %v1177_v47  ;;  %1868 = vmatpush3.msk.msra.mxu1 %vm191_vm1, %v1177_v47  ;;  %1254 = vmatprep.mubr.f32.mxu0 %v1999_v0 }
  0xad   : > { %1799 = vmatprep.subr.msk.mxu0 %vm191_vm1, %v1180_v49  ;;  %1870 = vmatmul.mubr.msk.f32.vlgmr.msra.gmra.mxu1 %vm187_vm2, %v1798_v45 }
  0xae   : > { %1800 = vmatpush1.msk.msra.mxu0 %vm191_vm1, %v1179_v48  ;;  %1872 = vmatprep.subr.mxu1 %v1999_v0 }
  0xaf   : > { %v1346_v51 = vpop.permute.xlu1 %1345  ;;  %1801 = vmatmul.mubr.msk.f32.vlgmr.msra.gmra.mxu0 %vm187_vm2, %v1798_v45  ;;  %v1344_v52 = vpop.permute.xlu0 %1343  ;;  %1874 = vmatprep.mubr.msk.f32.mxu1 %vm2000_vm0, %v1999_v0 }
  0xb0   : > { %v1349_v53 = vsel %vm1347_vm9, %v1344_v52, %v1346_v51  ;;  %1873 = vmatpush3.msk.msra.mxu1 %vm191_vm1, %v1346_v51  ;;  %1423 = vmatprep.mubr.f32.mxu0 %v1999_v0 }
  0xb1   : > { %1805 = vmatprep.subr.msk.mxu0 %vm191_vm1, %v1349_v53  ;;  %1875 = vmatmul.mubr.msk.f32.vlgmr.msra.gmra.mxu1 %vm187_vm2, %v1804_v50 }
  0xb2   : > { %1877 = vmatprep.subr.mxu1 %v1999_v0  ;;  %1879 = vmatprep.mubr.msk.f32.mxu1 %vm2000_vm0, %v1999_v0 }
  0xb3   : > { %v1513_v54 = vpop.permute.xlu1 %1512  ;;  %v1342_v55 = vpop.permute.xlu0 %1341 }
  0xb4   : > { %v1348_v56 = vsel %vm1347_vm9, %v1342_v55, %v1344_v52 }
  0xb5   : > { %1806 = vmatpush1.msk.msra.mxu0 %vm191_vm1, %v1348_v56 }
  0xb6   : > { %1807 = vmatmul.mubr.msk.f32.vlgmr.msra.gmra.mxu0 %vm187_vm2, %v1804_v50 }
  0xb7   : > { %v1511_v58 = vpop.permute.xlu1 %1510  ;;  %v1515_v59 = vpop.permute.xlu0 %1514  ;;  %1592 = vmatprep.mubr.f32.mxu0 %v1999_v0 }
  0xb8   : > { %v1517_v60 = vsel %vm1516_vm10, %v1511_v58, %v1513_v54  ;;  %v1518_v61 = vsel %vm1516_vm10, %v1513_v54, %v1515_v59  ;;  %1878 = vmatpush3.msk.msra.mxu1 %vm191_vm1, %v1515_v59 }
  0xb9   : > { %1811 = vmatprep.subr.msk.mxu0 %vm191_vm1, %v1518_v61  ;;  %1880 = vmatmul.mubr.msk.f32.vlgmr.msra.gmra.mxu1 %vm187_vm2, %v1810_v57 }
  0xba   : > { %1812 = vmatpush1.msk.msra.mxu0 %vm191_vm1, %v1517_v60 }
  0xbb   : > { %1813 = vmatmul.mubr.msk.f32.vlgmr.msra.gmra.mxu0 %vm187_vm2, %v1810_v57 }
  0xc4   : > { %v1675_v49 = vpop.permute.xlu0 %1674 }
 0x14d   : > { %v335_v62 = vpop.f32.mrf.mxu1 }
 0x14f   : > { %v1841_v63 = vpop.f32.mrf.mxu1 }
 0x151   : > { %v485_v1 = vpop.f32.mrf.mxu1 }
 0x152   : > { %v486_v14 = vadd.f32 %v485_v1, %v335_v62 }
 0x153   : > { %v1846_v2 = vpop.f32.mrf.mxu1 }
 0x155   : > { %v651_v3 = vpop.f32.mrf.mxu1 }
 0x156   : > { %v657_v19 = vadd.f32 %v651_v3, %v486_v14 }
 0x157   : > { %v264_v4 = vpop.f32.mrf.mxu0  ;;  %v1851_v5 = vpop.f32.mrf.mxu1 }
 0x159   : > { %v266_v0 = vpop.f32.mrf.mxu0 }
 0x15a   : > { %v820_v6 = vpop.f32.mrf.mxu1 }
 0x15b   : > { %v414_v7 = vpop.f32.mrf.mxu0  ;;  %v826_v23 = vadd.f32 %v820_v6, %v657_v19 }
 0x15c   : > { %v1856_v8 = vpop.f32.mrf.mxu1  ;;  %v415_v26 = vadd.f32 %v414_v7, %v264_v4 }
 0x15d   : > { %v416_v9 = vpop.f32.mrf.mxu0 }
 0x15e   : > { %v417_v28 = vadd.f32 %v416_v9, %v266_v0 }
 0x15f   : > { %v580_v10 = vpop.f32.mrf.mxu0 }
 0x160   : > { %v655_v29 = vadd.f32 %v580_v10, %v415_v26 }
 0x161   : > { %v582_v11 = vpop.f32.mrf.mxu0 }
 0x162   : > { %v989_v12 = vpop.f32.mrf.mxu1  ;;  %v656_v33 = vadd.f32 %v582_v11, %v417_v28 }
 0x163   : > { %v749_v13 = vpop.f32.mrf.mxu0  ;;  %v995_v30 = vadd.f32 %v989_v12, %v826_v23 }
 0x164   : > { %v1861_v15 = vpop.f32.mrf.mxu1  ;;  %v824_v34 = vadd.f32 %v749_v13, %v655_v29 }
 0x165   : > { %v751_v16 = vpop.f32.mrf.mxu0 }
 0x166   : > { %v1158_v17 = vpop.f32.mrf.mxu1  ;;  %v825_v36 = vadd.f32 %v751_v16, %v656_v33 }
 0x167   : > { %v918_v18 = vpop.f32.mrf.mxu0  ;;  %v1164_v38 = vadd.f32 %v1158_v17, %v995_v30 }
 0x168   : > { %v1866_v20 = vpop.f32.mrf.mxu1  ;;  %v993_v37 = vadd.f32 %v918_v18, %v824_v34 }
 0x169   : > { %v920_v21 = vpop.f32.mrf.mxu0 }
 0x16a   : > { %v994_v40 = vadd.f32 %v920_v21, %v825_v36 }
 0x16b   : > { %v1087_v22 = vpop.f32.mrf.mxu0 }
 0x16c   : > { %v1162_v41 = vadd.f32 %v1087_v22, %v993_v37 }
 0x16d   : > { %v1089_v24 = vpop.f32.mrf.mxu0  ;;  %v1327_v25 = vpop.f32.mrf.mxu1 }
 0x16e   : > { %v1333_v42 = vadd.f32 %v1327_v25, %v1164_v38  ;;  %v1163_v44 = vadd.f32 %v1089_v24, %v994_v40 }
 0x16f   : > { %v1871_v27 = vpop.f32.mrf.mxu1  ;;  %v1256_v31 = vpop.f32.mrf.mxu0 }
 0x170   : > { %v1331_v45 = vadd.f32 %v1256_v31, %v1162_v41 }
 0x171   : > { %v1496_v32 = vpop.f32.mrf.mxu1  ;;  %v1258_v39 = vpop.f32.mrf.mxu0 }
 0x172   : > { %v1502_v46 = vadd.f32 %v1496_v32, %v1333_v42  ;;  %v1332_v50 = vadd.f32 %v1258_v39, %v1163_v44 }
 0x173   : > { %v1876_v35 = vpop.f32.mrf.mxu1 }
 0x176   : > { %v1425_v43 = vpop.f32.mrf.mxu0 }
 0x177   : > { %v1500_v51 = vadd.f32 %v1425_v43, %v1331_v45 }
 0x178   : > { %v1427_v47 = vpop.f32.mrf.mxu0 }
 0x179   : > { %v1665_v48 = vpop.f32.mrf.mxu1  ;;  %v1501_v55 = vadd.f32 %v1427_v47, %v1332_v50 }
 0x17a   : > { %v1671_v52 = vadd.f32 %v1665_v48, %v1502_v46 }
 0x17b   : > { %v1594_v53 = vpop.f32.mrf.mxu0  ;;  %v1881_v54 = vpop.f32.mrf.mxu1 }
 0x17c   : > { %v1669_v56 = vadd.f32 %v1594_v53, %v1500_v51  ;;  %v1679_v57 = vadd.f32 %v1675_v49, %v1671_v52 }
 0x17d   : > { %v1596_v58 = vpop.f32.mrf.mxu0 }
 0x17e   : > { %v1677_v59 = vadd.f32 %v1675_v49, %v1669_v56  ;;  %1683 = vst.msk [vmem:[%s163_s24 + $0x10] sm:$0xff] %vm1682_vm11, %v1679_v57  ;;  %v1670_v60 = vadd.f32 %v1596_v58, %v1501_v55 }
 0x180   : > { %1680 = vst [vmem:[%s163_s24] sm:$0xff] %v1677_v59  ;;  %v1678_v61 = vadd.f32 %v1675_v49, %v1670_v60 }
 0x182   : > { %1681 = vst [vmem:[%s163_s24 + $0x8] sm:$0xff] %v1678_v61 }
 0x183   : > { %1950 = shalt.err (!%p1947_p3)
}
 0x184   : > { %s1951_s6 = scalar_lea.hbm %s1697_s28, 384  ;;  %s1955_s9 = scalar_lea.hbm %s2277_s3, 768 }
 0x185   : > { %p1952_p4 = scmp.ne.s32.totalorder %s1697_s28, %s1951_s6  ;;  %p1956_p9 = scmp.lt.s32.totalorder %s1697_s28, %s2277_s3 }
 0x186   : > { %p1957_p10 = scmp.lt.s32.totalorder %s1955_s9, %s1951_s6 }
 0x187   : > { %p1953_p7 = pnand %p1952_p4, %p2069_p5 }
 0x188   : > { %p1958_p11 = por %p1957_p10, %p1956_p9 }
 0x189   : > { %p1954_p8 = pneg %p1953_p7 }
 0x18b   : > { %p1959_p12 = pnand %p1958_p11, %p1954_p8 }
 0x18d   : > { %1962 = shalt.err (!%p1959_p12)
}
 0x18e   : > { %1885 = dma.vmem_to_hbm [thread:$0]  (%p2069_p5), %s1700_s25, 384, %s1697_s28, %s1685_s29  }
 0x18f PF: > { %p1891_p13 = scmp.ge.s32.totalorder %s1997_s15, 2  ;;  %s1711_s17 = sand.u32 1, %s1985_s12  }
 0x190   : > { %s1712_s19 = scalar_lea.sflag [#allocation3], %s1711_s17 }
 0x191   : > { %p1888_p0 = pnand %p1891_p13, %p2073_p6 }
 0x193   : > { %p1889_p1 = pneg %p1888_p0 }
 0x195   : > { %1980 = dma.done.wait (%p1889_p1), %s1712_s19, 384  }
 0x196   : > { %1982 = vsyncadd (%p1889_p1), %s1712_s19, 4294966912  ;;  %p13_p2 = scmp.ge.s32.totalorder %s2056_s18, 4   ;;  %s2280_s12 = smov %s1989_s13 }
 0x197   : > { %s2281_s13 = smov %s1993_s14  ;;  %s2282_s14 = smov %s2067_s21 }
 0x198   : > { %s2283_s15 = smov %s2056_s18  ;;  %15 = sbr.rel (!%p13_p2) target bundleno = 3 (0x3), region = 75 }
 0x19d   :  { %1717 = vsyncpa [#allocation3], 1 }
 0x19e   :  { %1719 = vsyncpa [#allocation3 + $0x1], 1 }

</bundles_post_ra>
